<compile_context>
chip_gen: v6e
topology: v6e:2x2x1
jax: 0.10.0
libtpu: 0.0.40
codegen_flags: <defaults>
</compile_context>

<pallas_src>
import functools
import math

import jax
import jax.numpy as jnp
from jax.experimental import pallas as pl
from jax.experimental.pallas import tpu as pltpu

B = 2             # batch
S = 8             # sequence length
D = 32            # embed_dim
H = 4             # num_heads
HD = D // H       # head_dim
N = B * S         # flattened token count
F32 = jnp.float32
NEG = -1e30       # additive mask value for cross-batch keys


# =====================================================================
# Fused multi-head self-attention kernel (whole problem in one step)
# =====================================================================
def mha_kernel(x_ref, prm_ref, *out_refs, need_weights):
    out_ref = out_refs[0]
    attw_ref = out_refs[1] if need_weights else None

    x2 = x_ref[...]                                   # (N, D) lane-dense activations

    # Packed params: one (D+1+N, 4D) = (49, 128) block; static slices are free.
    w_flat = prm_ref[0:D, 0:3 * D]                    # (D, 3D)  folded q/k/v weights
    wo_cat = prm_ref[0:D, 3 * D:4 * D]                # (D, D)   out_proj^T (in, out)
    b_flat = prm_ref[D:D + 1, 0:3 * D]                # (1, 3D)  folded q/k/v bias
    bo = prm_ref[D:D + 1, 3 * D:4 * D]                # (1, D)   out_proj bias
    mask = prm_ref[D + 1:D + 1 + N, 0:N]              # (N, N)   0 / -1e30 block-diag

    # --- ONE projection matmul (outer Linear + in_proj + q-scale folded) ---
    qkv = jnp.dot(x2, w_flat, preferred_element_type=F32) + b_flat      # (N, 3D)

    # --- head relayout: static lane slices -> leading head axis (H, N, HD) ---
    q = jnp.stack([qkv[:, h * HD:(h + 1) * HD] for h in range(H)], axis=0)
    k = jnp.stack([qkv[:, D + h * HD:D + (h + 1) * HD] for h in range(H)], axis=0)
    v = jnp.stack([qkv[:, 2 * D + h * HD:2 * D + (h + 1) * HD] for h in range(H)], axis=0)

    # --- attention over all N tokens at once (no Python batch loop) ---
    sc = jnp.einsum("hqd,hkd->hqk", q, k, preferred_element_type=F32)    # (H, N, N)
    sc = sc + mask                                                       # kill x-batch
    sc = sc - jnp.max(sc, axis=-1, keepdims=True)
    e = jnp.exp(sc)
    p = e * pl.reciprocal(jnp.sum(e, axis=-1, keepdims=True), approx=True)

    ctx = jnp.einsum("hqk,hkd->hqd", p, v, preferred_element_type=F32)   # (H, N, HD)

    # --- concat heads along lanes -> single K=D out-projection matmul ---
    ctx_cat = jnp.concatenate([ctx[h] for h in range(H)], axis=-1)        # (N, D)
    out_ref[...] = jnp.dot(ctx_cat, wo_cat, preferred_element_type=F32) + bo

    if need_weights:
        pm = jnp.sum(p, axis=0) * (1.0 / H)                               # head mean
        attw_ref[...] = jnp.concatenate(
            [pm[b * S:(b + 1) * S, b * S:(b + 1) * S] for b in range(B)], axis=0)


# =====================================================================
# Host-side parameter folding / packing (done once, outside the kernel)
# =====================================================================
def fold_params(p):
    """Fold outer q/k/v Linear + in_proj (+ query scale) and pack everything
    (weights, biases, block-diagonal additive mask) into ONE (D+1+N, 4D) block.

    q1 = (x @ Wq0^T + bq0) @ Wq1^T + bi_q = x @ (Wq1 @ Wq0)^T + (bq0 @ Wq1^T + bi_q)
    """
    scale = 1.0 / math.sqrt(HD)
    outer_w = (p["wq0"], p["wk0"], p["wv0"])
    outer_b = (p["bq0"], p["bk0"], p["bv0"])
    w_cols, b_cols = [], []
    for i in range(3):
        wi = p["wi"][i * D:(i + 1) * D]               # (D, D)  in_proj slice (out, in)
        bi = p["bi"][i * D:(i + 1) * D]               # (D,)
        w_eff = wi @ outer_w[i]                       # (D, D)  PyTorch (out, in) layout
        b_eff = outer_b[i] @ wi.T + bi                # (D,)
        if i == 0:                                    # fold query scaling into q
            w_eff = w_eff * scale
            b_eff = b_eff * scale
        w_cols.append(w_eff.T)                        # (D_in, D_out), head-major cols
        b_cols.append(b_eff)
    w_flat = jnp.concatenate(w_cols, axis=1)          # (D, 3D)
    b_flat = jnp.concatenate(b_cols)                  # (3D,)
    wo_cat = jnp.transpose(p["wo"])                   # (D, D)  out_proj^T (in, out)
    bo = p["bo"]                                      # (D,)

    tok = jnp.arange(N) // S                          # batch id of each flat token
    mask = jnp.where(tok[:, None] == tok[None, :], 0.0, NEG).astype(F32)   # (N, N)

    prm = jnp.zeros((D + 1 + N, 4 * D), F32)          # (49, 128), lane-dense
    prm = prm.at[0:D, 0:3 * D].set(w_flat)
    prm = prm.at[0:D, 3 * D:4 * D].set(wo_cat)
    prm = prm.at[D, 0:3 * D].set(b_flat)
    prm = prm.at[D, 3 * D:4 * D].set(bo)
    prm = prm.at[D + 1:D + 1 + N, 0:N].set(mask)
    return prm


def multihead_attention(x, prm, *, need_weights=True):
    x2 = x.reshape(N, D)                              # lane-dense activation slab
    vmem = lambda: pl.BlockSpec(memory_space=pltpu.MemorySpace.VMEM)
    out_shape = [jax.ShapeDtypeStruct((N, D), F32)]
    out_specs = [vmem()]
    if need_weights:
        out_shape.append(jax.ShapeDtypeStruct((N, S), F32))
        out_specs.append(vmem())
    res = pl.pallas_call(
        functools.partial(mha_kernel, need_weights=need_weights),
        out_shape=tuple(out_shape),
        in_specs=[vmem(), vmem()],
        out_specs=tuple(out_specs),
    )(x2, prm)
    out = res[0].reshape(B, S, D)
    attw = res[1].reshape(B, S, S) if need_weights else None
    return out, attw


# =====================================================================
# Pure-JAX reference (mirrors the PyTorch forward) for validation
# =====================================================================
def mha_reference(x, p):
    lin = lambda t, w, b: t @ w.T + b
    q = lin(lin(x, p["wq0"], p["bq0"]), p["wi"][0:D], p["bi"][0:D])
    k = lin(lin(x, p["wk0"], p["bk0"]), p["wi"][D:2 * D], p["bi"][D:2 * D])
    v = lin(lin(x, p["wv0"], p["bv0"]), p["wi"][2 * D:3 * D], p["bi"][2 * D:3 * D])
    q = q * (1.0 / math.sqrt(HD))
    split = lambda t: t.reshape(B, S, H, HD).transpose(0, 2, 1, 3)
    qh, kh, vh = split(q), split(k), split(v)
    sc = jnp.einsum("bhqd,bhkd->bhqk", qh, kh)
    pw = jax.nn.softmax(sc, axis=-1)
    ctx = jnp.einsum("bhqk,bhkd->bhqd", pw, vh)
    ctx = ctx.transpose(0, 2, 1, 3).reshape(B, S, D)
    out = ctx @ p["wo"].T + p["bo"]
    return out, pw.mean(axis=1)


def make_params(key):
    ks = jax.random.split(key, 10)
    u = lambda k, shape, s=0.2: jax.random.uniform(k, shape, F32, -s, s)
    return {
        "wq0": u(ks[0], (D, D)), "bq0": u(ks[1], (D,)),
        "wk0": u(ks[2], (D, D)), "bk0": u(ks[3], (D,)),
        "wv0": u(ks[4], (D, D)), "bv0": u(ks[5], (D,)),
        "wi": u(ks[6], (3 * D, D)), "bi": u(ks[7], (3 * D,)),
        "wo": u(ks[8], (D, D)), "bo": u(ks[9], (D,)),
    }


if __name__ == "__main__":
    key = jax.random.PRNGKey(0)
    kx, kp = jax.random.split(key)
    src = jax.random.normal(kx, (B, S, D), F32)
    raw = make_params(kp)
    prm = fold_params(raw)

    fwd = jax.jit(functools.partial(multihead_attention, need_weights=True))
    out, attw = fwd(src, prm)
    jax.block_until_ready(out)
    jax.block_until_ready(attw)

    assert out.shape == (B, S, D)
    assert attw.shape == (B, S, S)
    assert bool(jnp.all(jnp.isfinite(out)))
    assert bool(jnp.all(jnp.isfinite(attw)))

    # Validate the folded/fused kernel against the two-matmul reference.
    ref_out, ref_attw = mha_reference(src, raw)
    assert bool(jnp.allclose(out, ref_out, rtol=5e-3, atol=1e-3))
    assert bool(jnp.allclose(attw, ref_attw, rtol=5e-3, atol=1e-3))

    # Exercise the weights-skipped path (no attw store stream).
    fwd_nw = jax.jit(functools.partial(multihead_attention, need_weights=False))
    out_nw, attw_nw = fwd_nw(src, prm)
    jax.block_until_ready(out_nw)
    assert attw_nw is None
    assert bool(jnp.allclose(out_nw, out, rtol=1e-5, atol=1e-5))

    print("KERNEL_OK")
</pallas_src>

<mosaic_0001>
module attributes {stable_mosaic.version = 11 : i64} {
  func.func @mha_kernel(%arg0: memref<16x32xf32, #tpu.memory_space<vmem>>, %arg1: memref<49x128xf32, #tpu.memory_space<vmem>>, %arg2: memref<16x32xf32, #tpu.memory_space<vmem>>, %arg3: memref<16x8xf32, #tpu.memory_space<vmem>>) attributes {dimension_semantics = [], scalar_prefetch = 0 : i64, scratch_operands = 0 : i64, tpu.core_type = #tpu.core_type<tc>} {
    %c0 = arith.constant 0 : index
    %c0_0 = arith.constant 0 : index
    %0 = vector.load %arg0[%c0, %c0_0] : memref<16x32xf32, #tpu.memory_space<vmem>>, vector<16x32xf32>
    %c0_1 = arith.constant 0 : index
    %c0_2 = arith.constant 0 : index
    %1 = vector.load %arg1[%c0_1, %c0_2] : memref<49x128xf32, #tpu.memory_space<vmem>>, vector<32x96xf32>
    %c0_3 = arith.constant 0 : index
    %c96 = arith.constant 96 : index
    %2 = vector.load %arg1[%c0_3, %c96] : memref<49x128xf32, #tpu.memory_space<vmem>>, vector<32x32xf32>
    %c32 = arith.constant 32 : index
    %c0_4 = arith.constant 0 : index
    %3 = vector.load %arg1[%c32, %c0_4] : memref<49x128xf32, #tpu.memory_space<vmem>>, vector<1x96xf32>
    %c32_5 = arith.constant 32 : index
    %c96_6 = arith.constant 96 : index
    %4 = vector.load %arg1[%c32_5, %c96_6] : memref<49x128xf32, #tpu.memory_space<vmem>>, vector<1x32xf32>
    %c33 = arith.constant 33 : index
    %c0_7 = arith.constant 0 : index
    %5 = vector.load %arg1[%c33, %c0_7] : memref<49x128xf32, #tpu.memory_space<vmem>>, vector<16x16xf32>
    %cst = arith.constant dense<0.000000e+00> : vector<16x96xf32>
    %6 = tpu.matmul %0, %1, %cst {dimension_numbers = #tpu.dot_dimension_numbers<[1], [0], [0], [1], [0, 0, 1, 1], [], []>} : vector<16x32xf32>, vector<32x96xf32>, vector<16x96xf32> -> vector<16x96xf32>
    %7 = vector.broadcast %3 : vector<1x96xf32> to vector<16x96xf32>
    %8 = arith.addf %6, %7 : vector<16x96xf32>
    %9 = vector.extract_strided_slice %8 {offsets = [0, 0], sizes = [16, 8], strides = [1, 1]} : vector<16x96xf32> to vector<16x8xf32>
    %10 = vector.extract_strided_slice %8 {offsets = [0, 8], sizes = [16, 8], strides = [1, 1]} : vector<16x96xf32> to vector<16x8xf32>
    %11 = vector.extract_strided_slice %8 {offsets = [0, 16], sizes = [16, 8], strides = [1, 1]} : vector<16x96xf32> to vector<16x8xf32>
    %12 = vector.extract_strided_slice %8 {offsets = [0, 24], sizes = [16, 8], strides = [1, 1]} : vector<16x96xf32> to vector<16x8xf32>
    %13 = vector.shape_cast %9 : vector<16x8xf32> to vector<1x16x8xf32>
    %14 = vector.shape_cast %10 : vector<16x8xf32> to vector<1x16x8xf32>
    %15 = vector.shape_cast %11 : vector<16x8xf32> to vector<1x16x8xf32>
    %16 = vector.shape_cast %12 : vector<16x8xf32> to vector<1x16x8xf32>
    %17 = tpu.concatenate %13, %14, %15, %16 in 0 : vector<1x16x8xf32>, vector<1x16x8xf32>, vector<1x16x8xf32>, vector<1x16x8xf32> -> vector<4x16x8xf32>
    %18 = vector.extract_strided_slice %8 {offsets = [0, 32], sizes = [16, 8], strides = [1, 1]} : vector<16x96xf32> to vector<16x8xf32>
    %19 = vector.extract_strided_slice %8 {offsets = [0, 40], sizes = [16, 8], strides = [1, 1]} : vector<16x96xf32> to vector<16x8xf32>
    %20 = vector.extract_strided_slice %8 {offsets = [0, 48], sizes = [16, 8], strides = [1, 1]} : vector<16x96xf32> to vector<16x8xf32>
    %21 = vector.extract_strided_slice %8 {offsets = [0, 56], sizes = [16, 8], strides = [1, 1]} : vector<16x96xf32> to vector<16x8xf32>
    %22 = vector.shape_cast %18 : vector<16x8xf32> to vector<1x16x8xf32>
    %23 = vector.shape_cast %19 : vector<16x8xf32> to vector<1x16x8xf32>
    %24 = vector.shape_cast %20 : vector<16x8xf32> to vector<1x16x8xf32>
    %25 = vector.shape_cast %21 : vector<16x8xf32> to vector<1x16x8xf32>
    %26 = tpu.concatenate %22, %23, %24, %25 in 0 : vector<1x16x8xf32>, vector<1x16x8xf32>, vector<1x16x8xf32>, vector<1x16x8xf32> -> vector<4x16x8xf32>
    %27 = vector.extract_strided_slice %8 {offsets = [0, 64], sizes = [16, 8], strides = [1, 1]} : vector<16x96xf32> to vector<16x8xf32>
    %28 = vector.extract_strided_slice %8 {offsets = [0, 72], sizes = [16, 8], strides = [1, 1]} : vector<16x96xf32> to vector<16x8xf32>
    %29 = vector.extract_strided_slice %8 {offsets = [0, 80], sizes = [16, 8], strides = [1, 1]} : vector<16x96xf32> to vector<16x8xf32>
    %30 = vector.extract_strided_slice %8 {offsets = [0, 88], sizes = [16, 8], strides = [1, 1]} : vector<16x96xf32> to vector<16x8xf32>
    %31 = vector.shape_cast %27 : vector<16x8xf32> to vector<1x16x8xf32>
    %32 = vector.shape_cast %28 : vector<16x8xf32> to vector<1x16x8xf32>
    %33 = vector.shape_cast %29 : vector<16x8xf32> to vector<1x16x8xf32>
    %34 = vector.shape_cast %30 : vector<16x8xf32> to vector<1x16x8xf32>
    %35 = tpu.concatenate %31, %32, %33, %34 in 0 : vector<1x16x8xf32>, vector<1x16x8xf32>, vector<1x16x8xf32>, vector<1x16x8xf32> -> vector<4x16x8xf32>
    "tpu.trace_start"() <{level = 10 : i32, message = "hqd,hkd->hqk"}> : () -> ()
    %cst_8 = arith.constant dense<0.000000e+00> : vector<4x16x16xf32>
    %36 = tpu.matmul %17, %26, %cst_8 {dimension_numbers = #tpu.dot_dimension_numbers<[2], [2], [1], [1], [0, 0, 0, 1, 1, 1], [0], [0]>} : vector<4x16x8xf32>, vector<4x16x8xf32>, vector<4x16x16xf32> -> vector<4x16x16xf32>
    "tpu.trace_stop"() : () -> ()
    %37 = vector.shape_cast %5 : vector<16x16xf32> to vector<1x16x16xf32>
    %38 = vector.broadcast %37 : vector<1x16x16xf32> to vector<4x16x16xf32>
    %39 = arith.addf %36, %38 : vector<4x16x16xf32>
    %cst_9 = arith.constant dense<0xFF800000> : vector<4x16xf32>
    %40 = vector.multi_reduction <maximumf>, %39, %cst_9 [2] : vector<4x16x16xf32> to vector<4x16xf32>
    %41 = vector.shape_cast %40 : vector<4x16xf32> to vector<4x16x1xf32>
    %42 = vector.broadcast %41 : vector<4x16x1xf32> to vector<4x16x16xf32>
    %43 = arith.subf %39, %42 : vector<4x16x16xf32>
    %44 = math.exp %43 : vector<4x16x16xf32>
    %cst_10 = arith.constant dense<0.000000e+00> : vector<4x16xf32>
    %45 = vector.multi_reduction <add>, %44, %cst_10 [2] : vector<4x16x16xf32> to vector<4x16xf32>
    %46 = vector.shape_cast %45 : vector<4x16xf32> to vector<4x16x1xf32>
    %47 = tpu.reciprocal %46 {approx = true} : vector<4x16x1xf32> -> vector<4x16x1xf32>
    %48 = vector.broadcast %47 : vector<4x16x1xf32> to vector<4x16x16xf32>
    %49 = arith.mulf %44, %48 : vector<4x16x16xf32>
    "tpu.trace_start"() <{level = 10 : i32, message = "hqk,hkd->hqd"}> : () -> ()
    %cst_11 = arith.constant dense<0.000000e+00> : vector<4x16x8xf32>
    %50 = tpu.matmul %49, %35, %cst_11 {dimension_numbers = #tpu.dot_dimension_numbers<[2], [1], [1], [2], [0, 0, 0, 1, 1, 2], [0], [0]>} : vector<4x16x16xf32>, vector<4x16x8xf32>, vector<4x16x8xf32> -> vector<4x16x8xf32>
    "tpu.trace_stop"() : () -> ()
    %51 = vector.extract_strided_slice %50 {offsets = [0, 0, 0], sizes = [1, 16, 8], strides = [1, 1, 1]} : vector<4x16x8xf32> to vector<1x16x8xf32>
    %52 = vector.shape_cast %51 : vector<1x16x8xf32> to vector<16x8xf32>
    %53 = vector.extract_strided_slice %50 {offsets = [1, 0, 0], sizes = [1, 16, 8], strides = [1, 1, 1]} : vector<4x16x8xf32> to vector<1x16x8xf32>
    %54 = vector.shape_cast %53 : vector<1x16x8xf32> to vector<16x8xf32>
    %55 = vector.extract_strided_slice %50 {offsets = [2, 0, 0], sizes = [1, 16, 8], strides = [1, 1, 1]} : vector<4x16x8xf32> to vector<1x16x8xf32>
    %56 = vector.shape_cast %55 : vector<1x16x8xf32> to vector<16x8xf32>
    %57 = vector.extract_strided_slice %50 {offsets = [3, 0, 0], sizes = [1, 16, 8], strides = [1, 1, 1]} : vector<4x16x8xf32> to vector<1x16x8xf32>
    %58 = vector.shape_cast %57 : vector<1x16x8xf32> to vector<16x8xf32>
    %59 = tpu.concatenate %52, %54, %56, %58 in 1 : vector<16x8xf32>, vector<16x8xf32>, vector<16x8xf32>, vector<16x8xf32> -> vector<16x32xf32>
    %cst_12 = arith.constant dense<0.000000e+00> : vector<16x32xf32>
    %60 = tpu.matmul %59, %2, %cst_12 {dimension_numbers = #tpu.dot_dimension_numbers<[1], [0], [0], [1], [0, 0, 1, 1], [], []>} : vector<16x32xf32>, vector<32x32xf32>, vector<16x32xf32> -> vector<16x32xf32>
    %61 = vector.broadcast %4 : vector<1x32xf32> to vector<16x32xf32>
    %62 = arith.addf %60, %61 : vector<16x32xf32>
    %c0_13 = arith.constant 0 : index
    %c0_14 = arith.constant 0 : index
    %63 = vector.load %arg2[%c0_13, %c0_14] : memref<16x32xf32, #tpu.memory_space<vmem>>, vector<16x32xf32>
    tpu.vector_store %arg2[%c0_13, %c0_14], %62 {strides = array<i32>} : memref<16x32xf32, #tpu.memory_space<vmem>>, vector<16x32xf32>,
    %cst_15 = arith.constant dense<0.000000e+00> : vector<16x16xf32>
    %64 = vector.multi_reduction <add>, %49, %cst_15 [0] : vector<4x16x16xf32> to vector<16x16xf32>
    %cst_16 = arith.constant 2.500000e-01 : f32
    %65 = vector.broadcast %cst_16 : f32 to vector<16x16xf32>
    %66 = arith.mulf %64, %65 : vector<16x16xf32>
    %67 = vector.extract_strided_slice %66 {offsets = [0, 0], sizes = [8, 8], strides = [1, 1]} : vector<16x16xf32> to vector<8x8xf32>
    %68 = vector.extract_strided_slice %66 {offsets = [8, 8], sizes = [8, 8], strides = [1, 1]} : vector<16x16xf32> to vector<8x8xf32>
    %69 = tpu.concatenate %67, %68 in 0 : vector<8x8xf32>, vector<8x8xf32> -> vector<16x8xf32>
    %c0_17 = arith.constant 0 : index
    %c0_18 = arith.constant 0 : index
    %70 = vector.load %arg3[%c0_17, %c0_18] : memref<16x8xf32, #tpu.memory_space<vmem>>, vector<16x8xf32>
    tpu.vector_store %arg3[%c0_17, %c0_18], %69 {strides = array<i32>} : memref<16x8xf32, #tpu.memory_space<vmem>>, vector<16x8xf32>,
    return
  }
}

</mosaic_0001>

<bundles_post_ra>
// kernel: multihead_attention.1
= control target key start
LH: loop header
LB: loop body
LE: loop exit
PB: predicated region body
PF: predicated region fallthrough
CT: control target
= control target key end

     0   :  { %9 = vsyncpa [#allocation3], 0  ;;  %s1644_s0 = inlined_call_operand.hbm [shape: f32[16,32], index: 0, kind: input, shape index: {}]   ;;  %s1645_s1 = inlined_call_operand.hbm [shape: f32[49,128], index: 1, kind: input, shape index: {}]   ;;  %s1646_s2 = inlined_call_operand.hbm [shape: f32[16,32], index: 2, kind: output, shape index: {0}]   ;;  %s1647_s3 = inlined_call_operand.hbm [shape: f32[16,8], index: 3, kind: output, shape index: {1}]  }
   0x1   :  { %10 = vsyncpa [#allocation6], 0 }
   0x2   :  { %11 = vsyncpa [#allocation4], 0 }
   0x3   :  { %12 = vsyncpa [#allocation9], 0  ;;  %s1413_s12 = smov [#allocation2]  }
   0x4   :  { %s18_s13 = sshll.u32 %s1413_s12, 4  ;;  %s19_s13 = int_to_ptr.vmem [resolvable:$true] %s18_s13 }
   0x5   :  { %s1333_s14 = scalar_lea.vmem %s19_s13, 256  ;;  %p1338_p1 = scmp.lt.s32.totalorder %s19_s13, %s19_s13 }
   0x6   :  { %p1334_p0 = scmp.ne.s32.totalorder %s19_s13, %s1333_s14  ;;  %p1339_p2 = scmp.lt.s32.totalorder %s1333_s14, %s1333_s14 }
   0x8   :  { %p1340_p3 = por %p1339_p2, %p1338_p1 }
   0xa   :  { %p1341_p4 = pnand %p1340_p3, %p1334_p0 }
   0xc   :  { %1344 = shalt.err (!%p1341_p4)
}
   0xd   :  { %s1414_s15 = smov 128   ;;  %s1415_s16 = smov 8  }
   0xe   :  { %24 = dma.hbm_to_vmem [thread:$0]  %s1644_s0, 256, %s19_s13, [#allocation3], %s1414_s15, %s1414_s15, %s1415_s16  }
   0xf   :  { %s1416_s19 = smov [#allocation5]  }
  0x10   :  { %s30_s20 = sshll.u32 %s1416_s19, 4  ;;  %s31_s20 = int_to_ptr.vmem [resolvable:$true] %s30_s20 }
  0x11   :  { %s1353_s21 = scalar_lea.vmem %s31_s20, 896  ;;  %p1358_p6 = scmp.lt.s32.totalorder %s31_s20, %s31_s20 }
  0x12   :  { %p1354_p5 = scmp.ne.s32.totalorder %s31_s20, %s1353_s21  ;;  %p1359_p7 = scmp.lt.s32.totalorder %s1353_s21, %s1353_s21 }
  0x14   :  { %p1360_p8 = por %p1359_p7, %p1358_p6 }
  0x16   :  { %p1361_p9 = pnand %p1360_p8, %p1354_p5 }
  0x18   :  { %1364 = shalt.err (!%p1361_p9)
}
  0x19   :  { %36 = dma.hbm_to_vmem [thread:$0]  %s1645_s1, 896, %s31_s20, [#allocation6], %s1414_s15, %s1414_s15, %s1415_s16  }
  0x1a   :  { %1405 = dma.done.wait [#allocation3], 256  }
  0x1b   :  { %1406 = vsyncadd [#allocation3], 4294967040 }
  0x1c   :  { %1407 = dma.done.wait [#allocation6], 896  }
  0x1d   :  { %1408 = vsyncadd [#allocation6], 4294966400  ;;  %vm56_vm0 = vcmask 261120   ;;  %v1459_v0 = vld [vmem:[#allocation5 + $0x18] sm:$0xff]  ;;  %v1461_v1 = vld [vmem:[#allocation5 + $0x10] sm:$0xff]  ;;  %vm156_vm1 = vcmask 64512  }
  0x1e   :  { %1201 = vmatprep.subr.mxu0 %v1459_v0  ;;  %v43_v2 = vld [vmem:[#allocation2] sm:$0xff]  ;;  %v1465_v3 = vld [vmem:[#allocation5 + $0x8] sm:$0xff]  ;;  %v1470_v4 = vld [vmem:[#allocation5] sm:$0xff]  ;;  %s1417_s0 = smov 112   ;;  %s1418_s1 = smov 120   ;;  %vm501_vm2 = vcmask 130048  }
  0x1f   :  { %1202 = vmatpush3.msra.mxu0 %v1459_v0  ;;  %1209 = vmatprep.mubr.msk.f32.mxu0 %vm56_vm0, %v43_v2  ;;  %v44_v5 = vld [vmem:[#allocation2 + $0x8] sm:$0xff]  ;;  %v1477_v6 = vld [vmem:[#allocation5 + $0x20] ss:$0 sm:$0xff]  ;;  %s1419_s24 = smov 104   ;;  %s1420_s25 = smov 96   ;;  %v51_v25 = vld [vmem:[#allocation5 + $0x29] sm:$0xff] }
  0x20   :  { %1203 = vmatprep.subr.mxu0 %v1461_v1  ;;  %v50_v27 = vld [vmem:[#allocation5 + $0x21] sm:$0xff]  ;;  %s1421_s26 = smov 64   ;;  %s1422_s27 = smov 32   ;;  %vm966_vm3 = vcmask 195584  }
  0x21   :  { %1204 = vmatpush3.msra.mxu0 %v1461_v1  ;;  %s1423_s28 = smov 16   ;;  %s1424_s29 = smov 24  }
  0x22   :  { %1205 = vmatprep.subr.mxu0 %v1465_v3  ;;  %s1425_s30 = smov [#allocation8]  }
  0x23   :  { %1206 = vmatpush3.msra.mxu0 %v1465_v3  ;;  %s1111_s4 = sshll.u32 %s1425_s30, 4  ;;  %s1112_s4 = int_to_ptr.vmem [resolvable:$true] %s1111_s4 }
  0x24   :  { %1207 = vmatprep.subr.mxu0 %v1470_v4  ;;  %s1365_s5 = scalar_lea.vmem %s1112_s4, 256  ;;  %p1370_p11 = scmp.lt.s32.totalorder %s1112_s4, %s1112_s4 }
  0x25   :  { %1208 = vmatpush3.msra.mxu0 %v1470_v4  ;;  %p1366_p10 = scmp.ne.s32.totalorder %s1112_s4, %s1365_s5  ;;  %p1371_p12 = scmp.lt.s32.totalorder %s1365_s5, %s1365_s5 }
  0x26   :  { %1210 = vmatmul.mubr.msk.f32.vlgmr.msra.gmra.mxu0 %vm56_vm0, %v44_v5 }
  0x27   :  { %p1372_p13 = por %p1371_p12, %p1370_p11 }
  0x29   :  { %p1373_p0 = pnand %p1372_p13, %p1366_p10 }
  0xe6   :  { %v1211_v7 = vpop.f32.mrf.mxu0 }
  0xe7   :  { %v1480_v8 = vadd.f32 %v1211_v7, %v1477_v6 }
  0xe8   :  { %v129_v9 = vpop.f32.mrf.mxu0 }
  0xe9   :  { %v1483_v10 = vadd.f32 %v1477_v6, %v129_v9  ;;  %146 = vrot.lane.b32.xlu1 %v1480_v8, %s1417_s0  ;;  %142 = vrot.lane.b32.xlu0 %v1480_v8, %s1418_s1 }
  0xeb   :  { %1216 = vmatprep.mubr.msk.f32.mxu1 %vm156_vm1, %v1483_v10 }
  0xed   :  { %144 = vrot.lane.b32.xlu1 %v1483_v10, %s1417_s0  ;;  %140 = vrot.lane.b32.xlu0 %v1483_v10, %s1418_s1 }
  0xf1   :  { %148 = vrot.lane.b32.xlu1 %v1483_v10, %s1419_s24  ;;  %150 = vrot.lane.b32.xlu0 %v1480_v8, %s1419_s24 }
  0xf5   :  { %152 = vrot.lane.b32.xlu1 %v1483_v10, %s1420_s25  ;;  %154 = vrot.lane.b32.xlu0 %v1480_v8, %s1420_s25 }
 0x15b   :  { %v1497_v11 = vpop.permute.xlu1 %146  ;;  %v1499_v12 = vpop.permute.xlu0 %142 }
 0x15c   :  { %242 = vrot.lane.b32.xlu0 %v1499_v12, %s1420_s25 }
 0x15f   :  { %v1502_v13 = vpop.permute.xlu1 %144  ;;  %v1504_v14 = vpop.permute.xlu0 %140 }
 0x160   :  { %329 = vrot.lane.b32.xlu0 %v1497_v11, %s1420_s25  ;;  %1223 = vmatprep.mubr.msk.f32.mxu0 %vm156_vm1, %v1504_v14 }
 0x161   :  { %240 = vrot.lane.b32.xlu1 %v1504_v14, %s1420_s25 }
 0x163   :  { %v1510_v15 = vpop.permute.xlu1 %148  ;;  %v1512_v16 = vpop.permute.xlu0 %150 }
 0x164   :  { %416 = vrot.lane.b32.xlu0 %v1512_v16, %s1420_s25 }
 0x165   :  { %327 = vrot.lane.b32.xlu1 %v1502_v13, %s1420_s25 }
 0x167   :  { %v155_v17 = vpop.permute.xlu0 %154  ;;  %v153_v18 = vpop.permute.xlu1 %152 }
 0x168   :  { %1212 = vmatprep.subr.msk.mxu1 %vm156_vm1, %v155_v17 }
 0x169   :  { %414 = vrot.lane.b32.xlu1 %v1510_v15, %s1420_s25  ;;  %1213 = vmatpush3.xpose.msk.msra.mxu1 %vm156_vm1, %v155_v17 }
 0x16a   :  { %1214 = vmatprep.subr.msk.mxu1 %vm156_vm1, %v153_v18 }
 0x16d   :  { %1215 = vmatpush3.xpose.msk.msra.mxu1 %vm156_vm1, %v153_v18 }
 0x170   :  { %1217 = vmatmul.mubr.msk.f32.vlgmr.msra.gmra.mxu1 %vm156_vm1, %v1480_v8 }
 0x171   :  { %1230 = vmatprep.mubr.msk.f32.mxu1 %vm156_vm1, %v1502_v13 }
 0x1ce   :  { %v243_v19 = vpop.permute.xlu0 %242 }
 0x1cf   :  { %1219 = vmatprep.subr.msk.mxu0 %vm156_vm1, %v243_v19 }
 0x1d0   :  { %1220 = vmatpush3.xpose.msk.msra.mxu0 %vm156_vm1, %v243_v19 }
 0x1d2   :  { %v330_v20 = vpop.permute.xlu0 %329 }
 0x1d3   :  { %v241_v21 = vpop.permute.xlu1 %240  ;;  %1226 = vmatprep.subr.msk.mxu1 %vm156_vm1, %v330_v20 }
 0x1d4   :  { %1221 = vmatprep.subr.msk.mxu0 %vm156_vm1, %v241_v21  ;;  %1227 = vmatpush3.xpose.msk.msra.mxu1 %vm156_vm1, %v330_v20 }
 0x1d5   :  { %1222 = vmatpush3.xpose.msk.msra.mxu0 %vm156_vm1, %v241_v21 }
 0x1d6   :  { %v417_v22 = vpop.permute.xlu0 %416 }
 0x1d7   :  { %v328_v23 = vpop.permute.xlu1 %327  ;;  %1233 = vmatprep.subr.msk.mxu0 %vm156_vm1, %v417_v22 }
 0x1d8   :  { %1224 = vmatmul.mubr.msk.f32.vlgmr.msra.gmra.mxu0 %vm156_vm1, %v1499_v12  ;;  %1228 = vmatprep.subr.msk.mxu1 %vm156_vm1, %v328_v23 }
 0x1d9   :  { %1229 = vmatpush3.xpose.msk.msra.mxu1 %vm156_vm1, %v328_v23  ;;  %1234 = vmatpush3.xpose.msk.msra.mxu0 %vm156_vm1, %v417_v22 }
 0x1da   :  { %1237 = vmatprep.mubr.msk.f32.mxu0 %vm156_vm1, %v1510_v15 }
 0x1db   :  { %v415_v24 = vpop.permute.xlu1 %414 }
 0x1dc   :  { %1231 = vmatmul.mubr.msk.f32.vlgmr.msra.gmra.mxu1 %vm156_vm1, %v1497_v11  ;;  %1235 = vmatprep.subr.msk.mxu0 %vm156_vm1, %v415_v24 }
 0x1dd   :  { %1236 = vmatpush3.xpose.msk.msra.mxu0 %vm156_vm1, %v415_v24 }
 0x1e0   :  { %1238 = vmatmul.mubr.msk.f32.vlgmr.msra.gmra.mxu0 %vm156_vm1, %v1512_v16 }
 0x230   :  { %v1218_v26 = vpop.f32.mrf.mxu1 }
 0x231   :  { %v237_v28 = vadd.f32 %v1218_v26, %v51_v25 }
 0x232   :  { %v231_v29 = vpop.f32.mrf.mxu1 }
 0x233   :  { %v232_v30 = vadd.f32 %v231_v29, %v50_v27  ;;  %v505_v31 = vsel %vm501_vm2, %v237_v28, -inf }
 0x234   :  { %506 = vmax.xlane.f32.xlu1 %v505_v31 }
 0x235   :  { %v502_v32 = vsel %vm501_vm2, %v232_v30, -inf }
 0x236   :  { %503 = vmax.xlane.f32.xlu0 %v502_v32 }
 0x298   :  { %v1225_v33 = vpop.f32.mrf.mxu0 }
 0x299   :  { %v324_v37 = vadd.f32 %v1225_v33, %v51_v25 }
 0x29a   :  { %v318_v34 = vpop.f32.mrf.mxu0 }
 0x29b   :  { %v319_v35 = vadd.f32 %v318_v34, %v50_v27  ;;  %v511_v44 = vsel %vm501_vm2, %v324_v37, -inf }
 0x29c   :  { %v1232_v36 = vpop.f32.mrf.mxu1 }
 0x29d   :  { %v508_v38 = vsel %vm501_vm2, %v319_v35, -inf  ;;  %v411_v42 = vadd.f32 %v1232_v36, %v51_v25 }
 0x29e   :  { %v405_v39 = vpop.f32.mrf.mxu1  ;;  %509 = vmax.xlane.f32.xlu0 %v508_v38 }
 0x29f   :  { %v406_v40 = vadd.f32 %v405_v39, %v50_v27  ;;  %v517_v49 = vsel %vm501_vm2, %v411_v42, -inf }
 0x2a0   :  { %v1239_v41 = vpop.f32.mrf.mxu0 }
 0x2a1   :  { %v514_v43 = vsel %vm501_vm2, %v406_v40, -inf  ;;  %v498_v47 = vadd.f32 %v1239_v41, %v51_v25 }
 0x2a2   :  { %v492_v45 = vpop.f32.mrf.mxu0  ;;  %515 = vmax.xlane.f32.xlu1 %v514_v43  ;;  %512 = vmax.xlane.f32.xlu0 %v511_v44 }
 0x2a3   :  { %v493_v46 = vadd.f32 %v492_v45, %v50_v27  ;;  %v523_v50 = vsel %vm501_vm2, %v498_v47, -inf }
 0x2a5   :  { %v520_v48 = vsel %vm501_vm2, %v493_v46, -inf }
 0x2a6   :  { %521 = vmax.xlane.f32.xlu1 %v520_v48  ;;  %518 = vmax.xlane.f32.xlu0 %v517_v49 }
 0x2aa   :  { %524 = vmax.xlane.f32.xlu0 %v523_v50 }
 0x2b7   :  { %592 = vrot.lane.b32.xlu1 %v1480_v8, %s1421_s26 }
 0x2bb   :  { %679 = vrot.lane.b32.xlu1 %v1499_v12, %s1421_s26 }
 0x2bd   :  { %v507_v51 = vpop.xlane.xlu1 %506 }
 0x2be   :  { %v527_v52 = vsub.f32 %v237_v28, %v507_v51 }
 0x2bf   :  { %677 = vrot.lane.b32.xlu1 %v1504_v14, %s1421_s26  ;;  %v504_v53 = vpop.xlane.xlu0 %503 }
 0x2c0   :  { %590 = vrot.lane.b32.xlu0 %v1483_v10, %s1421_s26  ;;  %v536_v54 = vmul.f32 1.442695, %v527_v52  ;;  %v526_v55 = vsub.f32 %v232_v30, %v504_v53 }
 0x2c2   :  { %1293 = vpow2.f32 %v536_v54  ;;  %v534_v56 = vmul.f32 1.442695, %v526_v55 }
 0x2c3   :  { %764 = vrot.lane.b32.xlu1 %v1502_v13, %s1421_s26 }
 0x2c4   :  { %766 = vrot.lane.b32.xlu0 %v1497_v11, %s1421_s26  ;;  %1295 = vpow2.f32 %v534_v56 }
 0x2cf   :  { %v1565_v57 = vpop.eup %1293 }
 0x2d0   :  { %v553_v58 = vsel %vm501_vm2, %v1565_v57, 0.0 }
 0x2d1   :  { %v1569_v59 = vpop.eup %1295 }
 0x2d2   :  { %v550_v60 = vsel %vm501_vm2, %v1569_v59, 0.0 }
 0x2e3   :  { %554 = vadd.xlane.f32.xlu0 %v553_v58 }
 0x2e7   :  { %551 = vadd.xlane.f32.xlu1 %v550_v60 }
 0x327   :  { %v510_v61 = vpop.xlane.xlu0 %509 }
 0x328   :  { %v528_v62 = vsub.f32 %v319_v35, %v510_v61 }
 0x32a   :  { %v538_v63 = vmul.f32 1.442695, %v528_v62 }
 0x32b   :  { %v516_v2 = vpop.xlane.xlu1 %515  ;;  %v513_v5 = vpop.xlane.xlu0 %512 }
 0x32c   :  { %1297 = vpow2.f32 %v538_v63  ;;  %v530_v7 = vsub.f32 %v406_v40, %v516_v2  ;;  %v529_v8 = vsub.f32 %v324_v37, %v513_v5 }
 0x32e   :  { %v542_v9 = vmul.f32 1.442695, %v530_v7  ;;  %v540_v10 = vmul.f32 1.442695, %v529_v8 }
 0x32f   :  { %v522_v11 = vpop.xlane.xlu1 %521  ;;  %v519_v12 = vpop.xlane.xlu0 %518 }
 0x330   :  { %1299 = vpow2.f32 %v542_v9  ;;  %v532_v13 = vsub.f32 %v493_v46, %v522_v11  ;;  %v531_v14 = vsub.f32 %v411_v42, %v519_v12 }
 0x331   :  { %1301 = vpow2.f32 %v540_v10 }
 0x332   :  { %v546_v17 = vmul.f32 1.442695, %v532_v13  ;;  %v544_v18 = vmul.f32 1.442695, %v531_v14 }
 0x333   :  { %v593_v19 = vpop.permute.xlu1 %592  ;;  %v525_v20 = vpop.xlane.xlu0 %524 }
 0x334   :  { %1303 = vpow2.f32 %v546_v17  ;;  %v533_v21 = vsub.f32 %v498_v47, %v525_v20  ;;  %1240 = vmatprep.subr.mxu1 %v593_v19 }
 0x335   :  { %1305 = vpow2.f32 %v544_v18  ;;  %1241 = vmatpush3.msra.mxu1 %v593_v19 }
 0x336   :  { %v548_v22 = vmul.f32 1.442695, %v533_v21 }
 0x337   :  { %v591_v23 = vpop.permute.xlu0 %590  ;;  %v680_v25 = vpop.permute.xlu1 %679 }
 0x338   :  { %1307 = vpow2.f32 %v548_v22  ;;  %1242 = vmatprep.subr.mxu1 %v591_v23 }
 0x339   :  { %v1298_v24 = vpop.eup %1297  ;;  %1243 = vmatpush3.msra.mxu1 %v591_v23 }
 0x33a   :  { %1247 = vmatprep.subr.mxu1 %v680_v25  ;;  %v556_v26 = vsel %vm501_vm2, %v1298_v24, 0.0 }
 0x33b   :  { %557 = vadd.xlane.f32.xlu1 %v556_v26  ;;  %v678_v37 = vpop.permute.xlu1 %677  ;;  %v767_v38 = vpop.permute.xlu0 %766 }
 0x33d   :  { %v1300_v27 = vpop.eup %1299 }
 0x33e   :  { %v1302_v28 = vpop.eup %1301  ;;  %v562_v29 = vsel %vm501_vm2, %v1300_v27, 0.0 }
 0x33f   :  { %563 = vadd.xlane.f32.xlu1 %v562_v29  ;;  %v559_v30 = vsel %vm501_vm2, %v1302_v28, 0.0  ;;  %v765_v39 = vpop.permute.xlu1 %764 }
 0x340   :  { %560 = vadd.xlane.f32.xlu0 %v559_v30 }
 0x341   :  { %v1304_v31 = vpop.eup %1303 }
 0x342   :  { %v1576_v32 = vpop.eup %1305  ;;  %v568_v33 = vsel %vm501_vm2, %v1304_v31, 0.0 }
 0x343   :  { %569 = vadd.xlane.f32.xlu1 %v568_v33  ;;  %v565_v34 = vsel %vm501_vm2, %v1576_v32, 0.0 }
 0x344   :  { %566 = vadd.xlane.f32.xlu0 %v565_v34 }
 0x345   :  { %v1581_v35 = vpop.eup %1307 }
 0x346   :  { %v571_v36 = vsel %vm501_vm2, %v1581_v35, 0.0 }
 0x348   :  { %572 = vadd.xlane.f32.xlu0 %v571_v36 }
 0x354   :  { %851 = vrot.lane.b32.xlu1 %v1510_v15, %s1421_s26 }
 0x358   :  { %977 = vrot.lane.b32.xlu1 %v1461_v1, %s1422_s27 }
 0x35c   :  { %975 = vrot.lane.b32.xlu1 %v1465_v3, %s1422_s27 }
 0x35e   :  { %853 = vrot.lane.b32.xlu0 %v1512_v16, %s1421_s26 }
 0x362   :  { %979 = vrot.lane.b32.xlu0 %v1459_v0, %s1422_s27 }
 0x36c   :  { %v555_v40 = vpop.xlane.xlu0 %554 }
 0x36d   :  { %1309 = vrcp.f32 %v555_v40 }
 0x370   :  { %v552_v41 = vpop.xlane.xlu1 %551 }
 0x371   :  { %1311 = vrcp.f32 %v552_v41 }
 0x37a   :  { %v1310_v42 = vpop.eup %1309 }
 0x37b   :  { %v583_v45 = vmul.f32 %v1310_v42, %v1565_v57 }
 0x37d   :  { %v1079_v58 = vsel %vm501_vm2, %v583_v45, 0.0 }
 0x37e   :  { %v1312_v43 = vpop.eup %1311 }
 0x37f   :  { %v582_v44 = vmul.f32 %v1312_v43, %v1569_v59 }
 0x381   :  { %1244 = vmatprep.mubr.msk.f32.mxu1 %vm501_vm2, %v582_v44  ;;  %v1072_v55 = vsel %vm501_vm2, %v582_v44, 0.0 }
 0x382   :  { %1245 = vmatmul.mubr.msk.f32.vlgmr.msra.gmra.mxu1 %vm501_vm2, %v583_v45 }
 0x383   :  { %1248 = vmatpush3.msra.mxu1 %v680_v25 }
 0x384   :  { %1249 = vmatprep.subr.mxu1 %v678_v37 }
 0x385   :  { %1250 = vmatpush3.msra.mxu1 %v678_v37 }
 0x386   :  { %1254 = vmatprep.subr.mxu1 %v767_v38 }
 0x3c4   :  { %v558_v15 = vpop.xlane.xlu1 %557 }
 0x3c5   :  { %1313 = vrcp.f32 %v558_v15 }
 0x3c8   :  { %v564_v16 = vpop.xlane.xlu1 %563 }
 0x3c9   :  { %1315 = vrcp.f32 %v564_v16  ;;  %v561_v46 = vpop.xlane.xlu0 %560 }
 0x3ca   :  { %1317 = vrcp.f32 %v561_v46 }
 0x3cc   :  { %v570_v47 = vpop.xlane.xlu1 %569 }
 0x3cd   :  { %1319 = vrcp.f32 %v570_v47  ;;  %v567_v48 = vpop.xlane.xlu0 %566 }
 0x3ce   :  { %1321 = vrcp.f32 %v567_v48 }
 0x3d0   :  { %v852_v11 = vpop.permute.xlu1 %851 }
 0x3d1   :  { %v573_v49 = vpop.xlane.xlu0 %572 }
 0x3d2   :  { %v1314_v50 = vpop.eup %1313  ;;  %1323 = vrcp.f32 %v573_v49 }
 0x3d3   :  { %v584_v51 = vmul.f32 %v1314_v50, %v1298_v24 }
 0x3d4   :  { %v978_v20 = vpop.permute.xlu1 %977 }
 0x3d5   :  { %1251 = vmatprep.mubr.msk.f32.mxu1 %vm501_vm2, %v584_v51  ;;  %v1073_v1 = vsel %vm501_vm2, %v584_v51, 0.0  ;;  %v854_v5 = vpop.permute.xlu0 %853 }
 0x3d6   :  { %v1316_v0 = vpop.eup %1315  ;;  %v1074_v57 = vadd.f32 %v1073_v1, %v1072_v55 }
 0x3d7   :  { %v1318_v52 = vpop.eup %1317  ;;  %v586_v53 = vmul.f32 %v1316_v0, %v1300_v27 }
 0x3d8   :  { %v585_v54 = vmul.f32 %v1318_v52, %v1302_v28  ;;  %v976_v21 = vpop.permute.xlu1 %975 }
 0x3d9   :  { %v1075_v3 = vsel %vm501_vm2, %v586_v53, 0.0  ;;  %v980_v19 = vpop.permute.xlu0 %979 }
 0x3da   :  { %v1320_v56 = vpop.eup %1319  ;;  %1252 = vmatmul.mubr.msk.f32.vlgmr.msra.gmra.mxu1 %vm501_vm2, %v585_v54  ;;  %v1080_v59 = vsel %vm501_vm2, %v585_v54, 0.0  ;;  %v1076_v2 = vadd.f32 %v1075_v3, %v1074_v57  ;;  %1268 = vmatprep.subr.mxu0 %v980_v19 }
 0x3db   :  { %v1322_v60 = vpop.eup %1321  ;;  %1255 = vmatpush3.msra.mxu1 %v767_v38  ;;  %1258 = vmatprep.mubr.msk.f32.mxu1 %vm501_vm2, %v586_v53  ;;  %v588_v61 = vmul.f32 %v1320_v56, %v1304_v31  ;;  %v1081_v62 = vadd.f32 %v1080_v59, %v1079_v58 }
 0x3dc   :  { %1256 = vmatprep.subr.mxu1 %v765_v39  ;;  %v587_v63 = vmul.f32 %v1322_v60, %v1576_v32  ;;  %1269 = vmatpush3.msra.mxu0 %v980_v19 }
 0x3dd   :  { %1257 = vmatpush3.msra.mxu1 %v765_v39  ;;  %v1077_v7 = vsel %vm501_vm2, %v588_v61, 0.0  ;;  %1270 = vmatprep.subr.mxu0 %v978_v20 }
 0x3de   :  { %1261 = vmatprep.subr.mxu1 %v854_v5  ;;  %1259 = vmatmul.mubr.msk.f32.vlgmr.msra.gmra.mxu1 %vm501_vm2, %v587_v63  ;;  %v1082_v8 = vsel %vm501_vm2, %v587_v63, 0.0  ;;  %v1078_v9 = vadd.f32 %v1077_v7, %v1076_v2 }
 0x3df   :  { %v1324_v10 = vpop.eup %1323  ;;  %1262 = vmatpush3.msra.mxu1 %v854_v5  ;;  %1265 = vmatprep.mubr.msk.f32.mxu1 %vm501_vm2, %v588_v61  ;;  %v1083_v12 = vadd.f32 %v1082_v8, %v1081_v62 }
 0x3e0   :  { %1263 = vmatprep.subr.mxu1 %v852_v11  ;;  %v589_v13 = vmul.f32 %v1324_v10, %v1581_v35  ;;  %v1086_v14 = vmul.f32 0.25, %v1078_v9  ;;  %1271 = vmatpush3.msra.mxu0 %v978_v20 }
 0x3e1   :  { %1264 = vmatpush3.msra.mxu1 %v852_v11  ;;  %1272 = vmatprep.subr.mxu0 %v976_v21 }
 0x3e2   :  { %1266 = vmatmul.mubr.msk.f32.vlgmr.msra.gmra.mxu1 %vm501_vm2, %v589_v13  ;;  %v1084_v17 = vsel %vm501_vm2, %v589_v13, 0.0  ;;  %1092 = vst.msk [vmem:[#allocation8] sm:$0xff] %vm156_vm1, %v1086_v14  ;;  %1273 = vmatpush3.msra.mxu0 %v976_v21 }
 0x3e3   :  { %v1085_v18 = vadd.f32 %v1084_v17, %v1083_v12 }
 0x3e5   :  { %v1087_v30 = vmul.f32 0.25, %v1085_v18 }
 0x442   :  { %v1246_v22 = vpop.f32.mrf.mxu1 }
 0x444   :  { %v668_v23 = vpop.f32.mrf.mxu1 }
 0x49a   :  { %v1253_v24 = vpop.f32.mrf.mxu1 }
 0x49b   :  { %942 = vrot.lane.b32.xlu0 %v1253_v24, %s1415_s16 }
 0x49c   :  { %v755_v25 = vpop.f32.mrf.mxu1 }
 0x49e   :  { %v1260_v26 = vpop.f32.mrf.mxu1 }
 0x49f   :  { %940 = vrot.lane.b32.xlu0 %v755_v25, %s1415_s16 }
 0x4a0   :  { %v842_v27 = vpop.f32.mrf.mxu1 }
 0x4a1   :  { %948 = vrot.lane.b32.xlu1 %v842_v27, %s1423_s28 }
 0x4a2   :  { %v1267_v28 = vpop.f32.mrf.mxu1 }
 0x4a3   :  { %950 = vrot.lane.b32.xlu0 %v1260_v26, %s1423_s28 }
 0x4a4   :  { %v929_v29 = vpop.f32.mrf.mxu1 }
 0x4a5   :  { %956 = vrot.lane.b32.xlu1 %v929_v29, %s1424_s29 }
 0x4a7   :  { %973 = vrot.lane.b32.xlu0 %v1470_v4, %s1422_s27 }
 0x4a9   :  { %958 = vrot.lane.b32.xlu1 %v1267_v28, %s1424_s29 }
 0x4ab   :  { %986 = vrot.lane.b32.xlu0 %v1477_v6, %s1422_s27 }
 0x4ad   :  { %1089 = vrot.lane.b32.xlu1 %v1087_v30, %s1418_s1 }
 0x50d   :  { %v943_v31 = vpop.permute.xlu0 %942 }
 0x50e   :  { %v963_v39 = vsel %vm156_vm1, %v1246_v22, %v943_v31 }
 0x511   :  { %v941_v32 = vpop.permute.xlu0 %940 }
 0x512   :  { %v962_v34 = vsel %vm156_vm1, %v668_v23, %v941_v32 }
 0x513   :  { %v949_v33 = vpop.permute.xlu1 %948 }
 0x514   :  { %v964_v36 = vsel %vm501_vm2, %v962_v34, %v949_v33 }
 0x515   :  { %v951_v35 = vpop.permute.xlu0 %950 }
 0x516   :  { %v965_v6 = vsel %vm501_vm2, %v963_v39, %v951_v35 }
 0x517   :  { %v957_v37 = vpop.permute.xlu1 %956 }
 0x518   :  { %v967_v38 = vsel %vm966_vm3, %v964_v36, %v957_v37 }
 0x519   :  { %1276 = vmatprep.mubr.msk.f32.mxu0 %vm56_vm0, %v967_v38  ;;  %v974_v4 = vpop.permute.xlu0 %973 }
 0x51a   :  { %1274 = vmatprep.subr.mxu0 %v974_v4 }
 0x51b   :  { %v959_v40 = vpop.permute.xlu1 %958  ;;  %1275 = vmatpush3.msra.mxu0 %v974_v4 }
 0x51c   :  { %v968_v41 = vsel %vm966_vm3, %v965_v6, %v959_v40 }
 0x51d   :  { %1277 = vmatmul.mubr.msk.f32.vlgmr.msra.gmra.mxu0 %vm56_vm0, %v968_v41 }
 0x51f   :  { %v1090_v42 = vpop.permute.xlu1 %1089 }
 0x520   :  { %1093 = vst.msk [vmem:[#allocation8 + $0x8] sm:$0xff] %vm156_vm1, %v1090_v42 }
 0x521   :  { %1376 = shalt.err (!%p1373_p0)
}
 0x522   :  { %1117 = dma.vmem_to_hbm [thread:$0]  %s1112_s4, 256, %s1647_s3, [#allocation9], %s1414_s15, %s1414_s15, %s1415_s16   ;;  %v987_v43 = vpop.permute.xlu0 %986 }
 0x523   :  { %s1426_s8 = smov [#allocation7]  }
 0x524   :  { %s1099_s9 = sshll.u32 %s1426_s8, 4  ;;  %s1100_s9 = int_to_ptr.vmem [resolvable:$true] %s1099_s9 }
 0x525   :  { %s1385_s10 = scalar_lea.vmem %s1100_s9, 256  ;;  %p1390_p2 = scmp.lt.s32.totalorder %s1100_s9, %s1100_s9 }
 0x526   :  { %p1386_p1 = scmp.ne.s32.totalorder %s1100_s9, %s1385_s10  ;;  %p1391_p3 = scmp.lt.s32.totalorder %s1385_s10, %s1385_s10 }
 0x528   :  { %p1392_p4 = por %p1391_p3, %p1390_p2 }
 0x52a   :  { %p1393_p5 = pnand %p1392_p4, %p1386_p1 }
 0x5dd   :  { %v1278_v44 = vpop.f32.mrf.mxu0 }
 0x5de   :  { %v1067_v45 = vadd.f32 %v1278_v44, %v987_v43 }
 0x5df   :  { %v1061_v15 = vpop.f32.mrf.mxu0 }
 0x5e0   :  { %1071 = vst.msk [vmem:[#allocation7 + $0x8] sm:$0xff] %vm56_vm0, %v1067_v45  ;;  %v1062_v16 = vadd.f32 %v1061_v15, %v987_v43 }
 0x5e2   :  { %1070 = vst.msk [vmem:[#allocation7] sm:$0xff] %vm56_vm0, %v1062_v16 }
 0x5e3   :  { %1396 = shalt.err (!%p1393_p5)
}
 0x5e4   :  { %1105 = dma.vmem_to_hbm [thread:$0]  %s1100_s9, 256, %s1646_s2, [#allocation4], %s1414_s15, %s1414_s15, %s1415_s16  }
 0x5e5   :  { %1409 = dma.done.wait [#allocation4], 256  }
 0x5e6   :  { %1410 = vsyncadd [#allocation4], 4294967040 }
 0x5e7   :  { %1411 = dma.done.wait [#allocation9], 256  }
 0x5e8   :  { %1412 = vsyncadd [#allocation9], 4294967040 }
 0x5e9   :  { %1124 = vsyncpa [#allocation3], 1 }
 0x5ea   :  { %1125 = vsyncpa [#allocation6], 1 }
 0x5eb   :  { %1126 = vsyncpa [#allocation4], 1 }
 0x5ec   :  { %1127 = vsyncpa [#allocation9], 1 }

</bundles_post_ra>
